<compile_context>
chip_gen: v7x
topology: tpu7x:2x2x1
jax: 0.10.0
libtpu: 0.0.40
codegen_flags: <defaults>
</compile_context>

<pallas_src>
import functools

import jax
import jax.numpy as jnp
from jax.experimental import pallas as pl
from jax.experimental.pallas import tpu as pltpu

_LANES = 128
_SUBLANES = 8


def _bce_partial_kernel(t_ref, *rest, num_preds: int, tile_rows: int,
                        n_full_rows: int, rem_lanes: int, needs_mask: bool):
    """Per-tile partial sums for the BCE-with-logits loss.

    t_ref:   (tile_rows, 128) target tile (native dtype)
    rest:    num_preds prediction tiles (tile_rows, 128), then out_ref
    out_ref: (1, 1 + 2*num_preds, 1, 128) f32 per-tile vector partial sums:
             channel 0        -> sum(target)
             channel 1 + 2p   -> sum(target      * softplus(-x_p))
             channel 2 + 2p   -> sum((1-target)  * softplus(+x_p))
    """
    p_refs = rest[:num_preds]
    out_ref = rest[num_preds]
    i = pl.program_id(0)

    def tile_reduce(v):
        # (tile_rows, 128) -> (1, 128).  First pure VPU vreg adds (sublane
        # aligned), then one cross-sublane reduce (XLU slot, off the VALU path).
        if tile_rows % _SUBLANES == 0 and tile_rows > _SUBLANES:
            v = jnp.sum(v.reshape(tile_rows // _SUBLANES, _SUBLANES, _LANES),
                        axis=0)
        return jnp.sum(v, axis=0, keepdims=True)

    def compute(masked):
        y = t_ref[...].astype(jnp.float32)
        if masked:
            # Row-level validity (no int32 element-index overflow) plus a lane
            # compare on the single boundary row when n_total % 128 != 0.
            row_ids = jax.lax.broadcasted_iota(jnp.int32, (tile_rows, _LANES), 0)
            grow = i * tile_rows + row_ids
            valid = grow < n_full_rows
            if rem_lanes:
                lane_ids = jax.lax.broadcasted_iota(
                    jnp.int32, (tile_rows, _LANES), 1)
                valid = valid | ((grow == n_full_rows) & (lane_ids < rem_lanes))
            # jnp.where (select) so garbage/NaN in the ragged tail is truly
            # zeroed (0 * NaN would be NaN with a multiply-mask).
            y = jnp.where(valid, y, 0.0)
            om = jnp.where(valid, 1.0 - y, 0.0)
        else:
            valid = None
            om = 1.0 - y

        out_ref[0, 0, :, :] = tile_reduce(y)
        for p in range(num_preds):
            x = p_refs[p][...].astype(jnp.float32)
            if masked:
                x = jnp.where(valid, x, 0.0)  # keep softplus finite in the tail
            # Numerically stable softplus(x) = max(x, 0) + log1p(exp(-|x|));
            # exactly 2 transcendentals (exp + log1p) per prediction element.
            sp_pos = jnp.maximum(x, 0.0) + jnp.log1p(jnp.exp(-jnp.abs(x)))
            sp_neg = sp_pos - x  # softplus(-x)
            # BCEWithLogits: pos_weight*y*softplus(-x) + (1-y)*softplus(x);
            # beta is applied later in the wrapper.
            out_ref[0, 1 + 2 * p, :, :] = tile_reduce(y * sp_neg)
            out_ref[0, 2 + 2 * p, :, :] = tile_reduce(om * sp_pos)

    if needs_mask:
        last = pl.num_programs(0) - 1

        @pl.when(i != last)
        def _():
            compute(False)

        @pl.when(i == last)
        def _():
            compute(True)
    else:
        compute(False)


def _to_rows(arr, rows):
    """Flatten to (rows, 128); pad ONLY if n is not a multiple of 128."""
    flat = arr.reshape(-1)
    pad = rows * _LANES - flat.shape[0]
    if pad:
        flat = jnp.pad(flat, (0, pad))
    return flat.reshape(rows, _LANES)


def loss_function_forward(segbody_pred, segbody_target, loss_weight=None):
    """JAX/Pallas equivalent of LossFunction.forward for NUM_CLASSES == 1."""
    num_preds = len(segbody_pred)
    if num_preds > 1 and loss_weight is None:
        raise TypeError('loss_weight get None')

    target = jnp.asarray(segbody_target)
    preds = [jnp.asarray(p) for p in segbody_pred]
    n_total = int(target.size)
    rows = pl.cdiv(n_total, _LANES)
    n_full_rows = n_total // _LANES
    rem_lanes = n_total % _LANES

    # Tile sizing: target ~1 MiB per DMA buffer regardless of dtype, capped so
    # (1 + P) inputs x 2 (double buffer) stays inside an 8 MiB input budget
    # (well under v7x's 64 MiB physical VMEM and v5e's scoped default).
    bytes_per_elem = max(target.dtype.itemsize,
                         max(p.dtype.itemsize for p in preds))
    dma_rows = (1 << 20) // (_LANES * bytes_per_elem)             # ~1 MiB tiles
    vmem_rows = (8 << 20) // ((1 + num_preds) * 2 * _LANES * bytes_per_elem)
    cap = max(16, (min(dma_rows, vmem_rows) // 16) * 16)

    if rows <= 256:
        # Small input: one full-array block (block == array dims, always legal).
        tile_rows = rows
        grid = 1
    else:
        # Always >= 2 tiles so dimension_semantics=("parallel",) can shard the
        # grid across both v7x TensorCores; ragged last block handled in-kernel.
        half = -(-rows // 2)
        tile_rows = min(cap, ((half + 15) // 16) * 16)
        grid = pl.cdiv(rows, tile_rows)

    needs_mask = (rem_lanes != 0) or (rows % tile_rows != 0)

    t2d = _to_rows(target, rows)
    preds2d = [_to_rows(p, rows) for p in preds]

    num_out = 1 + 2 * num_preds
    kernel = functools.partial(
        _bce_partial_kernel, num_preds=num_preds, tile_rows=tile_rows,
        n_full_rows=n_full_rows, rem_lanes=rem_lanes, needs_mask=needs_mask)

    def make_tile_spec():
        return pl.BlockSpec((tile_rows, _LANES), lambda i: (i, 0))

    in_bytes = (1 + num_preds) * rows * _LANES * bytes_per_elem
    out_bytes = grid * num_out * _LANES * 4
    cost = pl.CostEstimate(
        flops=(4 + 12 * num_preds) * n_total,
        transcendentals=2 * num_preds * n_total,
        bytes_accessed=in_bytes + out_bytes)

    partials = pl.pallas_call(
        kernel,
        out_shape=jax.ShapeDtypeStruct((grid, num_out, 1, _LANES), jnp.float32),
        grid=(grid,),
        in_specs=[make_tile_spec()] + [make_tile_spec() for _ in range(num_preds)],
        out_specs=pl.BlockSpec((1, num_out, 1, _LANES),
                               lambda i: (i, 0, 0, 0)),
        compiler_params=pltpu.CompilerParams(
            dimension_semantics=("parallel",),
            vmem_limit_bytes=32 * 1024 * 1024,
        ),
        cost_estimate=cost,
    )(t2d, *preds2d)

    # Tiny final reduction + beta + weighting in plain JAX.
    sums = jnp.sum(partials, axis=(0, 2, 3))          # (1 + 2P,)
    sum_y = sums[0]
    count_pos = sum_y + 1e-10
    count_neg = float(n_total) - sum_y                 # == sum(1 - target)
    beta = count_neg / count_pos
    per_pred_mean = (beta * sums[1::2] + sums[2::2]) / float(n_total)

    if num_preds == 1:
        return per_pred_mean[0]
    weights = jnp.asarray(loss_weight, jnp.float32)
    return jnp.sum(weights * per_pred_mean)


def _reference_loss(segbody_pred, segbody_target, loss_weight):
    """Pure-JAX reference mirroring the PyTorch module (NUM_CLASSES == 1)."""
    y = jnp.asarray(segbody_target, jnp.float32)
    eps = 1e-10
    count_pos = jnp.sum(y) + eps
    count_neg = jnp.sum(1.0 - y)
    beta = count_neg / count_pos
    total = 0.0
    for p, w in zip(segbody_pred, loss_weight):
        x = jnp.asarray(p, jnp.float32)
        sp = jnp.maximum(x, 0.0) + jnp.log1p(jnp.exp(-jnp.abs(x)))  # softplus(x)
        elem = beta * y * (sp - x) + (1.0 - y) * sp
        total = total + w * jnp.mean(elem)
    return total


if __name__ == "__main__":
    key = jax.random.PRNGKey(0)

    # Case 1: lane-aligned (B*H*W % 128 == 0), two predictions + weights.
    B, H, W = 2, 16, 16
    k1, k2, k3 = jax.random.split(key, 3)
    target = (jax.random.uniform(k1, (B, H, W)) > 0.7).astype(jnp.float32)
    pred0 = jax.random.normal(k2, (B, H, W), dtype=jnp.float32)
    pred1 = jax.random.normal(k3, (B, H, W), dtype=jnp.float32)
    loss_weight = [0.6, 0.4]
    loss = jax.block_until_ready(
        loss_function_forward([pred0, pred1], target, loss_weight))
    ref = jax.block_until_ready(
        _reference_loss([pred0, pred1], target, loss_weight))
    assert jnp.allclose(loss, ref, rtol=1e-5, atol=1e-5), (loss, ref)

    # Case 2: misaligned element count (exercises the masked last-tile path)
    # and the single-prediction return path.
    B2, H2, W2 = 2, 13, 17
    k4, k5 = jax.random.split(k3, 2)
    target2 = (jax.random.uniform(k4, (B2, H2, W2)) > 0.6).astype(jnp.float32)
    pred2 = jax.random.normal(k5, (B2, H2, W2), dtype=jnp.float32)
    loss2 = jax.block_until_ready(loss_function_forward([pred2], target2))
    ref2 = jax.block_until_ready(_reference_loss([pred2], target2, [1.0]))
    assert jnp.allclose(loss2, ref2, rtol=1e-5, atol=1e-5), (loss2, ref2)

    # Case 3: multi-tile grid (>= 2 tiles, ragged last block) with two preds.
    B3, H3, W3 = 2, 160, 160
    k6, k7, k8 = jax.random.split(k5, 3)
    target3 = (jax.random.uniform(k6, (B3, H3, W3)) > 0.8).astype(jnp.float32)
    pred3a = jax.random.normal(k7, (B3, H3, W3), dtype=jnp.float32)
    pred3b = jax.random.normal(k8, (B3, H3, W3), dtype=jnp.float32)
    loss3 = jax.block_until_ready(
        loss_function_forward([pred3a, pred3b], target3, loss_weight))
    ref3 = jax.block_until_ready(
        _reference_loss([pred3a, pred3b], target3, loss_weight))
    assert jnp.allclose(loss3, ref3, rtol=1e-5, atol=1e-5), (loss3, ref3)

    print("KERNEL_OK")
</pallas_src>

<mosaic_0001>
module attributes {stable_mosaic.version = 11 : i64} {
  func.func @_bce_partial_kernel(%arg0: i32, %arg1: memref<4x128xf32, #tpu.memory_space<vmem>>, %arg2: memref<4x128xf32, #tpu.memory_space<vmem>>, %arg3: memref<4x128xf32, #tpu.memory_space<vmem>>, %arg4: memref<1x5x1x128xf32, #tpu.memory_space<vmem>>) attributes {dimension_semantics = [#tpu.dimension_semantics<parallel>], iteration_bounds = array<i64: 1>, scalar_prefetch = 0 : i64, scratch_operands = 0 : i64, tpu.core_type = #tpu.core_type<tc>, window_params = [{transform_indices = @transform_0, window_bounds = array<i64: 4, 128>}, {transform_indices = @transform_1, window_bounds = array<i64: 4, 128>}, {transform_indices = @transform_2, window_bounds = array<i64: 4, 128>}, {transform_indices = @transform_3, window_bounds = array<i64: 1, 5, 1, 128>}]} {
    %c0 = arith.constant 0 : index
    %c0_0 = arith.constant 0 : index
    %0 = vector.load %arg1[%c0, %c0_0] : memref<4x128xf32, #tpu.memory_space<vmem>>, vector<4x128xf32>
    %cst = arith.constant 1.000000e+00 : f32
    %1 = vector.broadcast %cst : f32 to vector<4x128xf32>
    %2 = arith.subf %1, %0 : vector<4x128xf32>
    %cst_1 = arith.constant dense<0.000000e+00> : vector<128xf32>
    %3 = vector.multi_reduction <add>, %0, %cst_1 [0] : vector<4x128xf32> to vector<128xf32>
    %4 = vector.shape_cast %3 : vector<128xf32> to vector<1x128xf32>
    %c0_2 = arith.constant 0 : index
    %c0_3 = arith.constant 0 : index
    %c0_4 = arith.constant 0 : index
    %c0_5 = arith.constant 0 : index
    %5 = vector.load %arg4[%c0_2, %c0_3, %c0_4, %c0_5] : memref<1x5x1x128xf32, #tpu.memory_space<vmem>>, vector<1x1x1x128xf32>
    %6 = vector.shape_cast %5 : vector<1x1x1x128xf32> to vector<1x128xf32>
    %7 = vector.shape_cast %4 : vector<1x128xf32> to vector<1x1x1x128xf32>
    tpu.vector_store %arg4[%c0_2, %c0_3, %c0_4, %c0_5], %7 {strides = array<i32>} : memref<1x5x1x128xf32, #tpu.memory_space<vmem>>, vector<1x1x1x128xf32>,
    %c0_6 = arith.constant 0 : index
    %c0_7 = arith.constant 0 : index
    %8 = vector.load %arg2[%c0_6, %c0_7] : memref<4x128xf32, #tpu.memory_space<vmem>>, vector<4x128xf32>
    %cst_8 = arith.constant 0.000000e+00 : f32
    %9 = vector.broadcast %cst_8 : f32 to vector<4x128xf32>
    %10 = arith.maximumf %8, %9 : vector<4x128xf32>
    %11 = math.absf %8 : vector<4x128xf32>
    %cst_9 = arith.constant 0.000000e+00 : f32
    %12 = vector.broadcast %cst_9 : f32 to vector<4x128xf32>
    %13 = arith.subf %12, %11 : vector<4x128xf32>
    %14 = math.exp %13 : vector<4x128xf32>
    %15 = math.log1p %14 : vector<4x128xf32>
    %16 = arith.addf %10, %15 : vector<4x128xf32>
    %17 = arith.subf %16, %8 : vector<4x128xf32>
    %18 = arith.mulf %0, %17 : vector<4x128xf32>
    %cst_10 = arith.constant dense<0.000000e+00> : vector<128xf32>
    %19 = vector.multi_reduction <add>, %18, %cst_10 [0] : vector<4x128xf32> to vector<128xf32>
    %20 = vector.shape_cast %19 : vector<128xf32> to vector<1x128xf32>
    %c0_11 = arith.constant 0 : index
    %c1 = arith.constant 1 : index
    %c0_12 = arith.constant 0 : index
    %c0_13 = arith.constant 0 : index
    %21 = vector.load %arg4[%c0_11, %c1, %c0_12, %c0_13] : memref<1x5x1x128xf32, #tpu.memory_space<vmem>>, vector<1x1x1x128xf32>
    %22 = vector.shape_cast %21 : vector<1x1x1x128xf32> to vector<1x128xf32>
    %23 = vector.shape_cast %20 : vector<1x128xf32> to vector<1x1x1x128xf32>
    tpu.vector_store %arg4[%c0_11, %c1, %c0_12, %c0_13], %23 {strides = array<i32>} : memref<1x5x1x128xf32, #tpu.memory_space<vmem>>, vector<1x1x1x128xf32>,
    %24 = arith.mulf %2, %16 : vector<4x128xf32>
    %cst_14 = arith.constant dense<0.000000e+00> : vector<128xf32>
    %25 = vector.multi_reduction <add>, %24, %cst_14 [0] : vector<4x128xf32> to vector<128xf32>
    %26 = vector.shape_cast %25 : vector<128xf32> to vector<1x128xf32>
    %c0_15 = arith.constant 0 : index
    %c2 = arith.constant 2 : index
    %c0_16 = arith.constant 0 : index
    %c0_17 = arith.constant 0 : index
    %27 = vector.load %arg4[%c0_15, %c2, %c0_16, %c0_17] : memref<1x5x1x128xf32, #tpu.memory_space<vmem>>, vector<1x1x1x128xf32>
    %28 = vector.shape_cast %27 : vector<1x1x1x128xf32> to vector<1x128xf32>
    %29 = vector.shape_cast %26 : vector<1x128xf32> to vector<1x1x1x128xf32>
    tpu.vector_store %arg4[%c0_15, %c2, %c0_16, %c0_17], %29 {strides = array<i32>} : memref<1x5x1x128xf32, #tpu.memory_space<vmem>>, vector<1x1x1x128xf32>,
    %c0_18 = arith.constant 0 : index
    %c0_19 = arith.constant 0 : index
    %30 = vector.load %arg3[%c0_18, %c0_19] : memref<4x128xf32, #tpu.memory_space<vmem>>, vector<4x128xf32>
    %cst_20 = arith.constant 0.000000e+00 : f32
    %31 = vector.broadcast %cst_20 : f32 to vector<4x128xf32>
    %32 = arith.maximumf %30, %31 : vector<4x128xf32>
    %33 = math.absf %30 : vector<4x128xf32>
    %cst_21 = arith.constant 0.000000e+00 : f32
    %34 = vector.broadcast %cst_21 : f32 to vector<4x128xf32>
    %35 = arith.subf %34, %33 : vector<4x128xf32>
    %36 = math.exp %35 : vector<4x128xf32>
    %37 = math.log1p %36 : vector<4x128xf32>
    %38 = arith.addf %32, %37 : vector<4x128xf32>
    %39 = arith.subf %38, %30 : vector<4x128xf32>
    %40 = arith.mulf %0, %39 : vector<4x128xf32>
    %cst_22 = arith.constant dense<0.000000e+00> : vector<128xf32>
    %41 = vector.multi_reduction <add>, %40, %cst_22 [0] : vector<4x128xf32> to vector<128xf32>
    %42 = vector.shape_cast %41 : vector<128xf32> to vector<1x128xf32>
    %c0_23 = arith.constant 0 : index
    %c3 = arith.constant 3 : index
    %c0_24 = arith.constant 0 : index
    %c0_25 = arith.constant 0 : index
    %43 = vector.load %arg4[%c0_23, %c3, %c0_24, %c0_25] : memref<1x5x1x128xf32, #tpu.memory_space<vmem>>, vector<1x1x1x128xf32>
    %44 = vector.shape_cast %43 : vector<1x1x1x128xf32> to vector<1x128xf32>
    %45 = vector.shape_cast %42 : vector<1x128xf32> to vector<1x1x1x128xf32>
    tpu.vector_store %arg4[%c0_23, %c3, %c0_24, %c0_25], %45 {strides = array<i32>} : memref<1x5x1x128xf32, #tpu.memory_space<vmem>>, vector<1x1x1x128xf32>,
    %46 = arith.mulf %2, %38 : vector<4x128xf32>
    %cst_26 = arith.constant dense<0.000000e+00> : vector<128xf32>
    %47 = vector.multi_reduction <add>, %46, %cst_26 [0] : vector<4x128xf32> to vector<128xf32>
    %48 = vector.shape_cast %47 : vector<128xf32> to vector<1x128xf32>
    %c0_27 = arith.constant 0 : index
    %c4 = arith.constant 4 : index
    %c0_28 = arith.constant 0 : index
    %c0_29 = arith.constant 0 : index
    %49 = vector.load %arg4[%c0_27, %c4, %c0_28, %c0_29] : memref<1x5x1x128xf32, #tpu.memory_space<vmem>>, vector<1x1x1x128xf32>
    %50 = vector.shape_cast %49 : vector<1x1x1x128xf32> to vector<1x128xf32>
    %51 = vector.shape_cast %48 : vector<1x128xf32> to vector<1x1x1x128xf32>
    tpu.vector_store %arg4[%c0_27, %c4, %c0_28, %c0_29], %51 {strides = array<i32>} : memref<1x5x1x128xf32, #tpu.memory_space<vmem>>, vector<1x1x1x128xf32>,
    return
  }
  func.func @transform_0(%arg0: i32) -> (i32, i32) {
    %c0_i32 = arith.constant 0 : i32
    %c0_i32_0 = arith.constant 0 : i32
    return %arg0, %c0_i32 : i32, i32
  }
  func.func @transform_1(%arg0: i32) -> (i32, i32) {
    %c0_i32 = arith.constant 0 : i32
    %c0_i32_0 = arith.constant 0 : i32
    return %arg0, %c0_i32 : i32, i32
  }
  func.func @transform_2(%arg0: i32) -> (i32, i32) {
    %c0_i32 = arith.constant 0 : i32
    %c0_i32_0 = arith.constant 0 : i32
    return %arg0, %c0_i32 : i32, i32
  }
  func.func @transform_3(%arg0: i32) -> (i32, i32, i32, i32) {
    %c0_i32 = arith.constant 0 : i32
    %c0_i32_0 = arith.constant 0 : i32
    %c0_i32_1 = arith.constant 0 : i32
    %c0_i32_2 = arith.constant 0 : i32
    return %arg0, %c0_i32, %c0_i32_0, %c0_i32_1 : i32, i32, i32, i32
  }
}

</mosaic_0001>

<bundles_post_ra>
// kernel: tpu_custom_call.1
= control target key start
LH: loop header
LB: loop body
LE: loop exit
PB: predicated region body
PF: predicated region fallthrough
CT: control target
= control target key end

     0   :  { %8 = vsyncpa [#allocation3], 0  ;;  %s296_s0 = inlined_call_operand.hbm [shape: f32[4,128], index: 0, kind: input, shape index: {}]   ;;  %s297_s1 = inlined_call_operand.hbm [shape: f32[4,128], index: 1, kind: input, shape index: {}]   ;;  %s298_s2 = inlined_call_operand.vmem [shape: f32[4,128], index: 2, kind: input, shape index: {}]   ;;  %s299_s3 = inlined_call_operand.hbm [shape: f32[1,5,1,128], index: 3, kind: output, shape index: {}]  }
   0x1   :  { %9 = vsyncpa [#allocation6], 0 }
   0x2   :  { %10 = vsyncpa [#allocation4], 0  ;;  %s227_s12 = smov [#allocation2]   ;;  %s228_s14 = smov [#allocation5]  }
   0x3   :  { %s17_s13 = sshll.u32 %s227_s12, 4  ;;  %s27_s15 = sshll.u32 %s228_s14, 4  ;;  %s18_s13 = int_to_ptr.vmem [resolvable:$true] %s17_s13  ;;  %s28_s15 = int_to_ptr.vmem [resolvable:$true] %s27_s15 }
   0x4   :  { %s155_s18 = scalar_lea.hbm %s296_s0, 64 }
   0x5   :  { %p156_p0 = scmp.ne.s32.totalorder %s296_s0, %s155_s18  ;;  %p159_p1 = scmp.lt.u32.totalorder %s155_s18, %s296_s0 }
   0x7   :  { %p161_p2 = pnand %p159_p1, %p156_p0 }
   0x9   :  { %164 = shalt.err (!%p161_p2)
}
   0xa   :  { %s165_s23 = scalar_lea.vmem %s18_s13, 64  ;;  %p170_p4 = scmp.lt.s32.totalorder %s18_s13, %s18_s13 }
   0xb   :  { %p166_p3 = scmp.ne.s32.totalorder %s18_s13, %s165_s23  ;;  %p171_p5 = scmp.lt.s32.totalorder %s165_s23, %s165_s23 }
   0xd   :  { %p172_p6 = por %p171_p5, %p170_p4 }
   0xf   :  { %p173_p7 = pnand %p172_p6, %p166_p3 }
  0x11   :  { %176 = shalt.err (!%p173_p7)
}
  0x12   :  { %20 = dma.hbm_to_vmem [thread:$0]  %s296_s0, 64, %s18_s13, [#allocation3]  }
  0x13   :  { %s177_s28 = scalar_lea.hbm %s297_s1, 64 }
  0x14   :  { %p178_p8 = scmp.ne.s32.totalorder %s297_s1, %s177_s28  ;;  %p181_p9 = scmp.lt.u32.totalorder %s177_s28, %s297_s1 }
  0x16   :  { %p183_p10 = pnand %p181_p9, %p178_p8 }
  0x18   :  { %186 = shalt.err (!%p183_p10)
}
  0x19   :  { %s187_s6 = scalar_lea.vmem %s28_s15, 64  ;;  %p192_p12 = scmp.lt.s32.totalorder %s28_s15, %s28_s15 }
  0x1a   :  { %p188_p11 = scmp.ne.s32.totalorder %s28_s15, %s187_s6  ;;  %p193_p13 = scmp.lt.s32.totalorder %s187_s6, %s187_s6 }
  0x1c   :  { %p194_p0 = por %p193_p13, %p192_p12 }
  0x1e   :  { %p195_p1 = pnand %p194_p0, %p188_p11 }
  0x20   :  { %198 = shalt.err (!%p195_p1)
}
  0x21   :  { %30 = dma.hbm_to_vmem [thread:$0]  %s297_s1, 64, %s28_s15, [#allocation6]  }
  0x22   :  { %221 = dma.done.wait [#allocation3], 64  }
  0x23   :  { %222 = vsyncadd [#allocation3], 4294967232 }
  0x24   :  { %223 = dma.done.wait [#allocation6], 64  }
  0x25   :  { %224 = vsyncadd [#allocation6], 4294967232  ;;  %vm41_vm0 = vcmask 1043456   ;;  %v39_v0 = vld [vmem:[#allocation2] sm:$0xf]  ;;  %s229_s1 = smov [#allocation7]  }
  0x26   :  { %v50_v1 = vld [vmem:[#allocation5] sm:$0xf]  ;;  %v87_v2 = vld [vmem:[%s298_s2] sm:$0xf]  ;;  %v42_v3 = vsel %vm41_vm0, %v39_v0, 0.0  ;;  %v40_v33 = vsub.f32 1.0, %v39_v0 }
  0x27   :  { %v52_v4 = vand.u32 2147483647, %v50_v1  ;;  %v43_v5 = vrot.slane %v42_v3, 4  ;;  %v89_v6 = vand.u32 2147483647, %v87_v2  ;;  %v51_v28 = vmax.f32 %v50_v1, 0.0 }
  0x28   :  { %v88_v32 = vmax.f32 %v87_v2, 0.0  ;;  %s129_s2 = sshll.u32 %s229_s1, 4  ;;  %s130_s2 = int_to_ptr.vmem [resolvable:$true] %s129_s2 }
  0x29   :  { %v53_v7 = vsub.f32 0.0, %v52_v4  ;;  %v44_v8 = vadd.f32 %v43_v5, %v42_v3  ;;  %v90_v9 = vsub.f32 0.0, %v89_v6  ;;  %s199_s10 = scalar_lea.vmem %s130_s2, 80  ;;  %s203_s11 = scalar_lea.vmem %s130_s2, 96 }
  0x2a   :  { %p200_p2 = scmp.ne.s32.totalorder %s130_s2, %s199_s10  ;;  %p204_p3 = scmp.lt.s32.totalorder %s130_s2, %s130_s2 }
  0x2b   :  { %v54_v10 = vmul.f32 1.442695, %v53_v7  ;;  %v45_v11 = vrot.slane %v44_v8, 2  ;;  %v91_v12 = vmul.f32 1.442695, %v90_v9  ;;  %p205_p4 = scmp.lt.s32.totalorder %s203_s11, %s199_s10 }
  0x2d   :  { %147 = vpow2.f32 %v54_v10  ;;  %v46_v13 = vadd.f32 %v45_v11, %v44_v8  ;;  %p206_p5 = por %p205_p4, %p204_p3 }
  0x2e   :  { %149 = vpow2.f32 %v91_v12 }
  0x2f   :  { %v47_v14 = vrot.slane %v46_v13, 1  ;;  %p207_p6 = pnand %p206_p5, %p200_p2 }
  0x31   :  { %v48_v15 = vadd.f32 %v47_v14, %v46_v13 }
  0x33   :  { %49 = vst [vmem:[#allocation7] sm:$0x1] %v48_v15 }
  0x37   :  { %v148_v16 = vpop.eup %147 }
  0x38   :  { %v150_v17 = vpop.eup %149  ;;  %v56_v18 = vadd.f32 1.0, %v148_v16  ;;  %v59_v20 = vmul.f32 -0.5, %v148_v16  ;;  %v62_v23 = vand.u32 2147483647, %v148_v16 }
  0x39   :  { %v93_v19 = vadd.f32 1.0, %v150_v17  ;;  %v96_v21 = vmul.f32 -0.5, %v150_v17  ;;  %v99_v25 = vand.u32 2147483647, %v150_v17 }
  0x3a   :  { %151 = vlog2.f32 %v56_v18  ;;  %v60_v22 = vadd.f32 1.0, %v59_v20  ;;  %vm63_vm1 = vcmp.lt.f32.partialorder %v62_v23, 0.0004427343 }
  0x3b   :  { %153 = vlog2.f32 %v93_v19  ;;  %v97_v24 = vadd.f32 1.0, %v96_v21  ;;  %vm100_vm2 = vcmp.lt.f32.partialorder %v99_v25, 0.0004427343 }
  0x3c   :  { %v61_v26 = vmul.f32 %v148_v16, %v60_v22 }
  0x3d   :  { %v98_v29 = vmul.f32 %v150_v17, %v97_v24 }
  0x44   :  { %v152_v27 = vpop.eup %151 }
  0x45   :  { %v154_v30 = vpop.eup %153  ;;  %v58_v31 = vmul.f32 0.6931472, %v152_v27 }
  0x46   :  { %v95_v34 = vmul.f32 0.6931472, %v154_v30 }
  0x47   :  { %v64_v35 = vsel %vm63_vm1, %v61_v26, %v58_v31 }
  0x48   :  { %v65_v36 = vadd.f32 %v64_v35, %v51_v28  ;;  %v101_v37 = vsel %vm100_vm2, %v98_v29, %v95_v34 }
  0x49   :  { %v102_v38 = vadd.f32 %v101_v37, %v88_v32 }
  0x4a   :  { %v66_v39 = vsub.f32 %v65_v36, %v50_v1  ;;  %v77_v40 = vmul.f32 %v65_v36, %v40_v33 }
  0x4b   :  { %v103_v41 = vsub.f32 %v102_v38, %v87_v2  ;;  %v114_v42 = vmul.f32 %v102_v38, %v40_v33 }
  0x4c   :  { %v67_v43 = vmul.f32 %v66_v39, %v39_v0  ;;  %v78_v44 = vsel %vm41_vm0, %v77_v40, 0.0 }
  0x4d   :  { %v79_v45 = vrot.slane %v78_v44, 4  ;;  %v104_v46 = vmul.f32 %v103_v41, %v39_v0  ;;  %v115_v47 = vsel %vm41_vm0, %v114_v42, 0.0 }
  0x4e   :  { %v68_v48 = vsel %vm41_vm0, %v67_v43, 0.0  ;;  %v116_v49 = vrot.slane %v115_v47, 4 }
  0x4f   :  { %v69_v50 = vrot.slane %v68_v48, 4  ;;  %v80_v51 = vadd.f32 %v79_v45, %v78_v44  ;;  %v105_v52 = vsel %vm41_vm0, %v104_v46, 0.0 }
  0x50   :  { %v106_v53 = vrot.slane %v105_v52, 4  ;;  %v117_v54 = vadd.f32 %v116_v49, %v115_v47 }
  0x51   :  { %v70_v55 = vadd.f32 %v69_v50, %v68_v48  ;;  %v81_v56 = vrot.slane %v80_v51, 2 }
  0x52   :  { %v107_v57 = vadd.f32 %v106_v53, %v105_v52  ;;  %v118_v58 = vrot.slane %v117_v54, 2 }
  0x53   :  { %v71_v59 = vrot.slane %v70_v55, 2  ;;  %v82_v60 = vadd.f32 %v81_v56, %v80_v51 }
  0x54   :  { %v108_v61 = vrot.slane %v107_v57, 2  ;;  %v119_v62 = vadd.f32 %v118_v58, %v117_v54 }
  0x55   :  { %v72_v63 = vadd.f32 %v71_v59, %v70_v55  ;;  %v83_v0 = vrot.slane %v82_v60, 1 }
  0x56   :  { %v109_v1 = vadd.f32 %v108_v61, %v107_v57  ;;  %v120_v2 = vrot.slane %v119_v62, 1 }
  0x57   :  { %v73_v3 = vrot.slane %v72_v63, 1  ;;  %v84_v4 = vadd.f32 %v83_v0, %v82_v60 }
  0x58   :  { %v110_v5 = vrot.slane %v109_v1, 1  ;;  %v121_v6 = vadd.f32 %v120_v2, %v119_v62 }
  0x59   :  { %v74_v7 = vadd.f32 %v73_v3, %v72_v63  ;;  %86 = vst [vmem:[#allocation7 + $0x2] sm:$0x1] %v84_v4 }
  0x5a   :  { %v111_v8 = vadd.f32 %v110_v5, %v109_v1  ;;  %123 = vst [vmem:[#allocation7 + $0x4] sm:$0x1] %v121_v6 }
  0x5b   :  { %76 = vst [vmem:[#allocation7 + $0x1] sm:$0x1] %v74_v7 }
  0x5c   :  { %113 = vst [vmem:[#allocation7 + $0x3] sm:$0x1] %v111_v8 }
  0x5d   :  { %210 = shalt.err (!%p207_p6)
}
  0x5e   :  { %s211_s14 = scalar_lea.hbm %s299_s3, 80 }
  0x5f   :  { %p212_p7 = scmp.ne.s32.totalorder %s299_s3, %s211_s14  ;;  %p215_p8 = scmp.lt.u32.totalorder %s211_s14, %s299_s3 }
  0x61   :  { %p217_p9 = pnand %p215_p8, %p212_p7 }
  0x63   :  { %220 = shalt.err (!%p217_p9)
}
  0x64   :  { %s230_s19 = smov 16   ;;  %s231_s20 = smov 1  }
  0x65   :  { %135 = dma.vmem_to_hbm [thread:$0]  %s130_s2, 80, %s299_s3, [#allocation4], %s230_s19, %s230_s19, %s231_s20  }
  0x66   :  { %225 = dma.done.wait [#allocation4], 80  }
  0x67   :  { %226 = vsyncadd [#allocation4], 4294967216 }
  0x68   :  { %139 = vsyncpa [#allocation3], 1 }
  0x69   :  { %140 = vsyncpa [#allocation6], 1 }
  0x6a   :  { %141 = vsyncpa [#allocation4], 1 }

</bundles_post_ra>
